<compile_context>
chip_gen: v6e
topology: v6e:2x2x1
jax: 0.10.0
libtpu: 0.0.40
codegen_flags: <defaults>
</compile_context>

<pallas_src>
import functools

import jax
import jax.numpy as jnp
from jax import lax
from jax.experimental import pallas as pl
from jax.experimental.pallas import tpu as pltpu

_FAR = 1e9   # sentinel coordinate for padded grid cells / padded GT rows


def _round_up(x, m):
    return ((x + m - 1) // m) * m


def _vmem_capacity_bytes():
    try:
        return int(pltpu.get_tpu_info().vmem_capacity_bytes)
    except Exception:
        return 64 * 1024 * 1024   # conservative fallback (v7x per-TC VMEM)


# ----------------------------------------------------------------------------
# Pallas kernel: one grid step == `batch_block` batch elements.
# ----------------------------------------------------------------------------
def _assigner_kernel(anc_ref, grid_ref, attrs_ref, cls_ref,
                     tbox_ref, scores_ref, fg_ref,
                     *, topk, anchor_t):
    _, nbp, _ = attrs_ref.shape           # padded n_max_boxes
    ng = grid_ref.shape[1]                # padded number of grid cells (lane dim)
    na = fg_ref.shape[1]                  # num_anchors

    gx = grid_ref[0:1, :].reshape(1, 1, ng)          # (1, 1, ng)
    gy = grid_ref[1:2, :].reshape(1, 1, ng)

    attrs = attrs_ref[...]                            # single (bt, nbp, 8) load
    cx = attrs[:, :, 0:1]                             # (bt, nbp, 1)
    cy = attrs[:, :, 1:2]
    gw = attrs[:, :, 2:3]
    gh = attrs[:, :, 3:4]
    mgt = attrs[:, :, 4:5]

    # -------- distance metric: |gx + 0.5 - cx| + |gy + 0.5 - cy| ------------
    dist = jnp.abs(gx + 0.5 - cx) + jnp.abs(gy + 0.5 - cy)      # (bt, nbp, ng)

    # small, broadcastable iotas (no full (bt,nbp,ng) i32 buffers kept live)
    col = lax.broadcasted_iota(jnp.int32, (1, 1, ng), 2)
    row = lax.broadcasted_iota(jnp.int32, (1, nbp, 1), 1)

    # -------- top-k smallest distances per GT (exact, lowest-index ties) ----
    big = jnp.float32(1e30)
    d = dist
    sel_any = None
    for _ in range(topk):
        m = jnp.min(d, axis=-1, keepdims=True)                             # (bt,nbp,1)
        idx = jnp.min(jnp.where(d == m, col, ng), axis=-1, keepdims=True)  # (bt,nbp,1)
        selb = col == idx                                                  # bool
        sel_any = selb if sel_any is None else (sel_any | selb)
        d = jnp.where(selb, big, d)

    # mask_topk is exactly 0/1, so select(mask_gt) == mask_topk * mask_gt
    mask_pos = jnp.where(sel_any, mgt, 0.0)                                # (bt,nbp,ng)
    fg = jnp.sum(mask_pos, axis=1, keepdims=True)                          # (bt,1,ng)

    # -------- resolve cells assigned to multiple GTs (keep nearest GT) ------
    min_d = jnp.min(dist, axis=1, keepdims=True)                           # (bt,1,ng)
    min_idx = jnp.min(jnp.where(dist == min_d, row, nbp),
                      axis=1, keepdims=True)                               # (bt,1,ng)
    # fused conflict resolution (no onehot_min temporary)
    mask_pos = jnp.where((fg > 1.0) & (row != min_idx), 0.0, mask_pos)
    fg = jnp.sum(mask_pos, axis=1, keepdims=True)

    # -------- target gt index per cell: first GT with mask_pos == 1 ---------
    tgt = jnp.min(jnp.where(mask_pos > 0.5, row, nbp), axis=1, keepdims=True)
    tgt = jnp.where(tgt == nbp, 0, tgt)
    onehot = (row == tgt).astype(jnp.float32)                              # (bt,nbp,ng)

    # -------- box attrs via exact VPU one-hot sums --------------------------
    t_cx = jnp.sum(onehot * cx, axis=1, keepdims=True)                     # (bt,1,ng)
    t_cy = jnp.sum(onehot * cy, axis=1, keepdims=True)
    t_w = jnp.sum(onehot * gw, axis=1, keepdims=True)
    t_h = jnp.sum(onehot * gh, axis=1, keepdims=True)

    # single coalesced (bt, 4, ng) store:  [tx, ty, w, h]
    tbox_ref[...] = jnp.concatenate([t_cx - gx, t_cy - gy, t_w, t_h], axis=1)

    # -------- class scores via the MXU (0/1 x 0/1 -> exact) -----------------
    scores_ref[...] = jnp.einsum('bcn,bng->bcg', cls_ref[...], onehot,
                                 preferred_element_type=jnp.float32)

    # -------- anchor-ratio mask (exact division form) + fg mask (int8) ------
    fgb = fg > 0.0
    t = jnp.float32(anchor_t)
    rows = []
    for a in range(na):                       # anchors are SMEM scalars
        aw = anc_ref[2 * a]
        ah = anc_ref[2 * a + 1]
        rw = t_w / aw
        rh = t_h / ah
        ok = (rw < t) & (1.0 / rw < t) & (rh < t) & (1.0 / rh < t)
        rows.append((fgb & ok).astype(jnp.float32))
    fg_ref[...] = jnp.concatenate(rows, axis=1).astype(jnp.int8)


# ----------------------------------------------------------------------------
# Wrapper: packs/pads inputs, calls pallas_call, restores the PyTorch layout.
# ----------------------------------------------------------------------------
@functools.partial(jax.jit,
                   static_argnames=("topk", "num_classes", "anchor_t",
                                    "batch_block", "broadcast_outputs"))
def task_nearest_assigner(anc_wh, grid, gt_labels, gt_cxys, gt_whs, mask_gt,
                          *, topk=3, num_classes=20, anchor_t=4.0,
                          batch_block=None, broadcast_outputs=True):
    na = anc_wh.shape[0]
    bs, nb = gt_labels.shape[0], gt_labels.shape[1]
    ng = grid.shape[0]

    if nb == 0:
        # mirror the PyTorch early-exit
        return None, None, None, jnp.zeros((1,), dtype=jnp.bool_)

    # ---- padded / blocked problem sizes -------------------------------------
    ng_pad = _round_up(ng, 128)               # lane-dense outputs
    nb_pad = _round_up(nb, 8)                 # sublane-aligned GT dim

    vmem_cap = _vmem_capacity_bytes()
    if batch_block is None:
        # per-batch-element per-step VMEM estimate: ~8 live (nb,ng) f32 temporaries
        # plus double-buffered input/output tiles.
        per_b = (8 * nb_pad * ng_pad
                 + 2 * (4 + num_classes + na + 8) * ng_pad) * 4
        budget = int(vmem_cap * 0.5)
        batch_block = max(1, min(bs, budget // max(per_b, 1)))
        if bs >= 2:
            # keep the batch grid >= 2 steps so the "parallel" axis can shard
            # across both v7x TensorCores and the pipeline stays busy.
            batch_block = min(batch_block, max(1, bs // 2))
    batch_block = max(1, int(batch_block))
    bs_pad = _round_up(bs, batch_block)

    # ---- grid coords, channel-first, padded cells pushed FAR away -----------
    grid_t = jnp.full((2, ng_pad), _FAR, jnp.float32)
    grid_t = grid_t.at[:, :ng].set(grid.T.astype(jnp.float32))

    # ---- packed per-GT attrs: [cx, cy, w, h, mask, 0, 0, 0] ------------------
    zeros = jnp.zeros((bs, nb), jnp.float32)
    cols = jnp.stack([
        gt_cxys[..., 0].astype(jnp.float32),
        gt_cxys[..., 1].astype(jnp.float32),
        gt_whs[..., 0].astype(jnp.float32),
        gt_whs[..., 1].astype(jnp.float32),
        mask_gt.reshape(bs, nb).astype(jnp.float32),
        zeros, zeros, zeros,
    ], axis=-1)                                                        # (bs, nb, 8)
    pad_row = jnp.array([_FAR, _FAR, 1.0, 1.0, 0.0, 0.0, 0.0, 0.0], jnp.float32)
    attrs = jnp.broadcast_to(pad_row, (bs_pad, nb_pad, 8))
    attrs = attrs.at[:bs, :nb].set(cols)

    # ---- one-hot label matrix (bs, nc, nb) for the MXU class-score gather ----
    onehot_lab = jax.nn.one_hot(gt_labels.astype(jnp.int32), num_classes,
                                dtype=jnp.float32)                     # (bs, nb, nc)
    cls_mat = jnp.zeros((bs_pad, num_classes, nb_pad), jnp.float32)
    cls_mat = cls_mat.at[:bs, :, :nb].set(jnp.transpose(onehot_lab, (0, 2, 1)))

    # ---- anchors as SMEM scalars: [w0, h0, w1, h1, ...] ----------------------
    anc_flat = anc_wh.astype(jnp.float32).reshape(-1)                  # (2*na,)

    kernel = functools.partial(_assigner_kernel, topk=topk, anchor_t=float(anchor_t))

    def per_batch(c):
        return pl.BlockSpec((batch_block, c, ng_pad), lambda b: (b, 0, 0))

    vmem_limit = max(32 * 1024 * 1024,
                     min(int(vmem_cap * 0.85), 112 * 1024 * 1024))

    tbox, scores, fg = pl.pallas_call(
        kernel,
        out_shape=(
            jax.ShapeDtypeStruct((bs_pad, 4, ng_pad), jnp.float32),            # [tx,ty,w,h]
            jax.ShapeDtypeStruct((bs_pad, num_classes, ng_pad), jnp.float32),  # scores
            jax.ShapeDtypeStruct((bs_pad, na, ng_pad), jnp.int8),              # fg mask
        ),
        grid=(bs_pad // batch_block,),
        in_specs=[
            pl.BlockSpec(memory_space=pltpu.MemorySpace.SMEM),                 # anchors
            pl.BlockSpec((2, ng_pad), lambda b: (0, 0)),                       # grid coords
            pl.BlockSpec((batch_block, nb_pad, 8), lambda b: (b, 0, 0)),       # GT attrs
            pl.BlockSpec((batch_block, num_classes, nb_pad), lambda b: (b, 0, 0)),
        ],
        out_specs=[
            per_batch(4),
            per_batch(num_classes),
            per_batch(na),
        ],
        compiler_params=pltpu.CompilerParams(
            dimension_semantics=("parallel",),
            vmem_limit_bytes=vmem_limit),
    )(anc_flat, grid_t, attrs, cls_mat)

    # ---- strip padding, restore the PyTorch output layout --------------------
    tbox = tbox[:bs, :, :ng]
    scores = scores[:bs, :, :ng]
    fg_bool = fg[:bs, :, :ng] != 0

    t_box = jnp.transpose(tbox, (0, 2, 1))                              # (bs, ng, 4)
    t_scores = jnp.transpose(scores, (0, 2, 1))                         # (bs, ng, nc)
    anc_out = anc_wh.reshape(1, na, 1, 2).astype(jnp.float32)

    if not broadcast_outputs:
        # compact views (na broadcast is pure redundancy) -- preferred for losses
        return t_box, t_scores, anc_out, fg_bool

    target_bboxes = jnp.broadcast_to(t_box[:, None], (bs, na, ng, 4))
    target_scores = jnp.broadcast_to(t_scores[:, None], (bs, na, ng, num_classes))
    return target_bboxes, target_scores, anc_out, fg_bool


# ----------------------------------------------------------------------------
# Pure-JAX reference mirroring the PyTorch module (for validation).
# ----------------------------------------------------------------------------
def reference(anc_wh, grid, gt_labels, gt_cxys, gt_whs, mask_gt,
              *, topk, num_classes, anchor_t, na):
    bs, nb = gt_labels.shape[0], gt_labels.shape[1]
    ng = grid.shape[0]
    deltas = grid[None, None] + 0.5 - gt_cxys[:, :, None, :]      # (bs, nb, ng, 2)
    dist = jnp.abs(deltas).sum(-1)                                # (bs, nb, ng)
    _, topk_idx = lax.top_k(-dist, topk)
    mask_topk = jax.nn.one_hot(topk_idx, ng, dtype=jnp.float32).sum(-2)
    mask_pos = mask_topk * mask_gt.reshape(bs, nb, 1)
    fg = mask_pos.sum(-2)                                         # (bs, ng)
    multi = fg[:, None, :] > 1
    min_idx = jnp.argmin(dist, axis=-2)                           # (bs, ng)
    onehot_min = jnp.transpose(jax.nn.one_hot(min_idx, nb, dtype=jnp.float32), (0, 2, 1))
    non_overlaps = jnp.where(multi, onehot_min, 1.0)
    mask_pos = non_overlaps * mask_pos
    fg = mask_pos.sum(-2)
    tgt_idx = jnp.argmax(mask_pos, axis=-2)                       # (bs, ng)
    b_ind = jnp.arange(bs)[:, None]
    t_cxy = gt_cxys[b_ind, tgt_idx]                               # (bs, ng, 2)
    t_wh = gt_whs[b_ind, tgt_idx]
    t_lab = gt_labels[b_ind, tgt_idx].astype(jnp.int32)
    t_txy = t_cxy - grid[None]
    scores = jax.nn.one_hot(t_lab, num_classes, dtype=jnp.float32)
    anc = anc_wh.reshape(1, na, 1, 2)
    t_wh_e = jnp.broadcast_to(t_wh[:, None], (bs, na, ng, 2))
    r = t_wh_e / anc
    mask_anc = jnp.max(jnp.maximum(r, 1.0 / r), axis=-1) < anchor_t
    fg_out = (fg[:, None, :] * mask_anc) > 0
    bboxes = jnp.concatenate(
        [jnp.broadcast_to(t_txy[:, None], (bs, na, ng, 2)), t_wh_e], -1)
    scores_e = jnp.broadcast_to(scores[:, None], (bs, na, ng, num_classes))
    return bboxes, scores_e, anc, fg_out


if __name__ == "__main__":
    def run_case(bs, nb, na, H, W, topk, num_classes, anchor_t):
        ng = H * W
        key = jax.random.PRNGKey(0)
        k1, k2, k3, k4, k5 = jax.random.split(key, 5)

        ys, xs = jnp.meshgrid(jnp.arange(H), jnp.arange(W), indexing="ij")
        grid = jnp.stack([xs.reshape(-1), ys.reshape(-1)], axis=-1).astype(jnp.float32)

        anc_wh = jax.random.uniform(k1, (na, 2), minval=1.0, maxval=6.0)
        gt_cxys = jax.random.uniform(k2, (bs, nb, 2), minval=0.0, maxval=float(min(H, W)))
        gt_whs = jax.random.uniform(k3, (bs, nb, 2), minval=0.5, maxval=8.0)
        gt_labels = jax.random.randint(k4, (bs, nb), 0, num_classes).astype(jnp.float32)
        mask_gt = (jax.random.uniform(k5, (bs, nb, 1)) > 0.25).astype(jnp.float32)

        out_bboxes, out_scores, out_anc, out_fg = jax.block_until_ready(
            task_nearest_assigner(anc_wh, grid, gt_labels, gt_cxys, gt_whs, mask_gt,
                                  topk=topk, num_classes=num_classes, anchor_t=anchor_t))

        ref_bboxes, ref_scores, ref_anc, ref_fg = reference(
            anc_wh, grid, gt_labels, gt_cxys, gt_whs, mask_gt,
            topk=topk, num_classes=num_classes, anchor_t=anchor_t, na=na)

        assert out_bboxes.shape == (bs, na, ng, 4)
        assert out_scores.shape == (bs, na, ng, num_classes)
        assert out_anc.shape == (1, na, 1, 2)
        assert out_fg.shape == (bs, na, ng) and out_fg.dtype == jnp.bool_
        assert jnp.allclose(out_bboxes, ref_bboxes, atol=1e-5)
        assert jnp.allclose(out_scores, ref_scores, atol=1e-5)
        assert jnp.allclose(out_anc, ref_anc, atol=1e-6)
        assert bool(jnp.all(out_fg == ref_fg))

    # Case 1: original toy config (ng already a multiple of 128).
    run_case(bs=2, nb=8, na=3, H=16, W=16, topk=3, num_classes=20, anchor_t=4.0)
    # Case 2: exercises ng / nb / bs padding (ng=195 -> 256).
    run_case(bs=3, nb=5, na=4, H=15, W=13, topk=5, num_classes=11, anchor_t=3.0)

    print("KERNEL_OK")
</pallas_src>

<mosaic_0001>
module attributes {stable_mosaic.version = 11 : i64} {
  func.func @_assigner_kernel(%arg0: i32, %arg1: memref<6xf32, #tpu.memory_space<smem>>, %arg2: memref<2x256xf32, #tpu.memory_space<vmem>>, %arg3: memref<1x8x8xf32, #tpu.memory_space<vmem>>, %arg4: memref<1x20x8xf32, #tpu.memory_space<vmem>>, %arg5: memref<1x4x256xf32, #tpu.memory_space<vmem>>, %arg6: memref<1x20x256xf32, #tpu.memory_space<vmem>>, %arg7: memref<1x3x256xi8, #tpu.memory_space<vmem>>) attributes {dimension_semantics = [#tpu.dimension_semantics<parallel>], iteration_bounds = array<i64: 2>, scalar_prefetch = 0 : i64, scratch_operands = 0 : i64, tpu.core_type = #tpu.core_type<tc>, window_params = [{transform_indices = @transform_0, window_bounds = array<i64: 6>}, {pipeline_mode = #tpu.pipeline_mode<synchronous>, transform_indices = @transform_1, window_bounds = array<i64: 2, 256>}, {transform_indices = @transform_2, window_bounds = array<i64: 1, 8, 8>}, {transform_indices = @transform_3, window_bounds = array<i64: 1, 20, 8>}, {transform_indices = @transform_4, window_bounds = array<i64: 1, 4, 256>}, {transform_indices = @transform_5, window_bounds = array<i64: 1, 20, 256>}, {transform_indices = @transform_6, window_bounds = array<i64: 1, 3, 256>}]} {
    %c0 = arith.constant 0 : index
    %c0_0 = arith.constant 0 : index
    %0 = vector.load %arg2[%c0, %c0_0] : memref<2x256xf32, #tpu.memory_space<vmem>>, vector<1x256xf32>
    %1 = vector.shape_cast %0 : vector<1x256xf32> to vector<1x1x256xf32>
    %c1 = arith.constant 1 : index
    %c0_1 = arith.constant 0 : index
    %2 = vector.load %arg2[%c1, %c0_1] : memref<2x256xf32, #tpu.memory_space<vmem>>, vector<1x256xf32>
    %3 = vector.shape_cast %2 : vector<1x256xf32> to vector<1x1x256xf32>
    %c0_2 = arith.constant 0 : index
    %c0_3 = arith.constant 0 : index
    %c0_4 = arith.constant 0 : index
    %4 = vector.load %arg3[%c0_2, %c0_3, %c0_4] : memref<1x8x8xf32, #tpu.memory_space<vmem>>, vector<1x8x8xf32>
    %5 = vector.extract_strided_slice %4 {offsets = [0, 0, 0], sizes = [1, 8, 1], strides = [1, 1, 1]} : vector<1x8x8xf32> to vector<1x8x1xf32>
    %6 = vector.extract_strided_slice %4 {offsets = [0, 0, 1], sizes = [1, 8, 1], strides = [1, 1, 1]} : vector<1x8x8xf32> to vector<1x8x1xf32>
    %7 = vector.extract_strided_slice %4 {offsets = [0, 0, 2], sizes = [1, 8, 1], strides = [1, 1, 1]} : vector<1x8x8xf32> to vector<1x8x1xf32>
    %8 = vector.extract_strided_slice %4 {offsets = [0, 0, 3], sizes = [1, 8, 1], strides = [1, 1, 1]} : vector<1x8x8xf32> to vector<1x8x1xf32>
    %9 = vector.extract_strided_slice %4 {offsets = [0, 0, 4], sizes = [1, 8, 1], strides = [1, 1, 1]} : vector<1x8x8xf32> to vector<1x8x1xf32>
    %cst = arith.constant 5.000000e-01 : f32
    %10 = vector.broadcast %cst : f32 to vector<1x1x256xf32>
    %11 = arith.addf %1, %10 : vector<1x1x256xf32>
    %12 = vector.broadcast %11 : vector<1x1x256xf32> to vector<1x8x256xf32>
    %13 = vector.broadcast %5 : vector<1x8x1xf32> to vector<1x8x256xf32>
    %14 = arith.subf %12, %13 : vector<1x8x256xf32>
    %15 = math.absf %14 : vector<1x8x256xf32>
    %cst_5 = arith.constant 5.000000e-01 : f32
    %16 = vector.broadcast %cst_5 : f32 to vector<1x1x256xf32>
    %17 = arith.addf %3, %16 : vector<1x1x256xf32>
    %18 = vector.broadcast %17 : vector<1x1x256xf32> to vector<1x8x256xf32>
    %19 = vector.broadcast %6 : vector<1x8x1xf32> to vector<1x8x256xf32>
    %20 = arith.subf %18, %19 : vector<1x8x256xf32>
    %21 = math.absf %20 : vector<1x8x256xf32>
    %22 = arith.addf %15, %21 : vector<1x8x256xf32>
    %23 = tpu.iota {dimensions = array<i32: 2>} : vector<1x1x256xi32>
    %24 = tpu.iota {dimensions = array<i32: 1>} : vector<1x8x1xi32>
    %cst_6 = arith.constant dense<0x7F800000> : vector<1x8xf32>
    %25 = vector.multi_reduction <minimumf>, %22, %cst_6 [2] : vector<1x8x256xf32> to vector<1x8xf32>
    %26 = vector.shape_cast %25 : vector<1x8xf32> to vector<1x8x1xf32>
    %27 = vector.broadcast %26 : vector<1x8x1xf32> to vector<1x8x256xf32>
    %28 = arith.cmpf oeq, %22, %27 : vector<1x8x256xf32>
    %c256_i32 = arith.constant 256 : i32
    %29 = vector.shape_cast %23 : vector<1x1x256xi32> to vector<1x1x256xi32>
    %30 = vector.broadcast %29 : vector<1x1x256xi32> to vector<1x8x256xi32>
    %31 = vector.broadcast %c256_i32 : i32 to vector<1x8x256xi32>
    %32 = arith.select %28, %30, %31 : vector<1x8x256xi1>, vector<1x8x256xi32>
    %cst_7 = arith.constant dense<2147483647> : vector<1x8xi32>
    %33 = vector.multi_reduction <minsi>, %32, %cst_7 [2] : vector<1x8x256xi32> to vector<1x8xi32>
    %34 = vector.shape_cast %33 : vector<1x8xi32> to vector<1x8x1xi32>
    %35 = vector.broadcast %23 : vector<1x1x256xi32> to vector<1x8x256xi32>
    %36 = vector.broadcast %34 : vector<1x8x1xi32> to vector<1x8x256xi32>
    %37 = arith.cmpi eq, %35, %36 : vector<1x8x256xi32>
    %cst_8 = arith.constant 1.000000e+30 : f32
    %38 = vector.broadcast %cst_8 : f32 to vector<1x8x256xf32>
    %39 = arith.select %37, %38, %22 : vector<1x8x256xi1>, vector<1x8x256xf32>
    %cst_9 = arith.constant dense<0x7F800000> : vector<1x8xf32>
    %40 = vector.multi_reduction <minimumf>, %39, %cst_9 [2] : vector<1x8x256xf32> to vector<1x8xf32>
    %41 = vector.shape_cast %40 : vector<1x8xf32> to vector<1x8x1xf32>
    %42 = vector.broadcast %41 : vector<1x8x1xf32> to vector<1x8x256xf32>
    %43 = arith.cmpf oeq, %39, %42 : vector<1x8x256xf32>
    %c256_i32_10 = arith.constant 256 : i32
    %44 = vector.shape_cast %23 : vector<1x1x256xi32> to vector<1x1x256xi32>
    %45 = vector.broadcast %44 : vector<1x1x256xi32> to vector<1x8x256xi32>
    %46 = vector.broadcast %c256_i32_10 : i32 to vector<1x8x256xi32>
    %47 = arith.select %43, %45, %46 : vector<1x8x256xi1>, vector<1x8x256xi32>
    %cst_11 = arith.constant dense<2147483647> : vector<1x8xi32>
    %48 = vector.multi_reduction <minsi>, %47, %cst_11 [2] : vector<1x8x256xi32> to vector<1x8xi32>
    %49 = vector.shape_cast %48 : vector<1x8xi32> to vector<1x8x1xi32>
    %50 = vector.broadcast %23 : vector<1x1x256xi32> to vector<1x8x256xi32>
    %51 = vector.broadcast %49 : vector<1x8x1xi32> to vector<1x8x256xi32>
    %52 = arith.cmpi eq, %50, %51 : vector<1x8x256xi32>
    %53 = arith.ori %37, %52 : vector<1x8x256xi1>
    %cst_12 = arith.constant 1.000000e+30 : f32
    %54 = vector.broadcast %cst_12 : f32 to vector<1x8x256xf32>
    %55 = arith.select %52, %54, %39 : vector<1x8x256xi1>, vector<1x8x256xf32>
    %cst_13 = arith.constant dense<0x7F800000> : vector<1x8xf32>
    %56 = vector.multi_reduction <minimumf>, %55, %cst_13 [2] : vector<1x8x256xf32> to vector<1x8xf32>
    %57 = vector.shape_cast %56 : vector<1x8xf32> to vector<1x8x1xf32>
    %58 = vector.broadcast %57 : vector<1x8x1xf32> to vector<1x8x256xf32>
    %59 = arith.cmpf oeq, %55, %58 : vector<1x8x256xf32>
    %c256_i32_14 = arith.constant 256 : i32
    %60 = vector.shape_cast %23 : vector<1x1x256xi32> to vector<1x1x256xi32>
    %61 = vector.broadcast %60 : vector<1x1x256xi32> to vector<1x8x256xi32>
    %62 = vector.broadcast %c256_i32_14 : i32 to vector<1x8x256xi32>
    %63 = arith.select %59, %61, %62 : vector<1x8x256xi1>, vector<1x8x256xi32>
    %cst_15 = arith.constant dense<2147483647> : vector<1x8xi32>
    %64 = vector.multi_reduction <minsi>, %63, %cst_15 [2] : vector<1x8x256xi32> to vector<1x8xi32>
    %65 = vector.shape_cast %64 : vector<1x8xi32> to vector<1x8x1xi32>
    %66 = vector.broadcast %23 : vector<1x1x256xi32> to vector<1x8x256xi32>
    %67 = vector.broadcast %65 : vector<1x8x1xi32> to vector<1x8x256xi32>
    %68 = arith.cmpi eq, %66, %67 : vector<1x8x256xi32>
    %69 = arith.ori %53, %68 : vector<1x8x256xi1>
    %cst_16 = arith.constant 0.000000e+00 : f32
    %70 = vector.shape_cast %9 : vector<1x8x1xf32> to vector<1x8x1xf32>
    %71 = vector.broadcast %70 : vector<1x8x1xf32> to vector<1x8x256xf32>
    %72 = vector.broadcast %cst_16 : f32 to vector<1x8x256xf32>
    %73 = arith.select %69, %71, %72 : vector<1x8x256xi1>, vector<1x8x256xf32>
    %cst_17 = arith.constant dense<0.000000e+00> : vector<1x256xf32>
    %74 = vector.multi_reduction <add>, %73, %cst_17 [1] : vector<1x8x256xf32> to vector<1x256xf32>
    %75 = vector.shape_cast %74 : vector<1x256xf32> to vector<1x1x256xf32>
    %cst_18 = arith.constant dense<0x7F800000> : vector<1x256xf32>
    %76 = vector.multi_reduction <minimumf>, %22, %cst_18 [1] : vector<1x8x256xf32> to vector<1x256xf32>
    %77 = vector.shape_cast %76 : vector<1x256xf32> to vector<1x1x256xf32>
    %78 = vector.broadcast %77 : vector<1x1x256xf32> to vector<1x8x256xf32>
    %79 = arith.cmpf oeq, %22, %78 : vector<1x8x256xf32>
    %c8_i32 = arith.constant 8 : i32
    %80 = vector.shape_cast %24 : vector<1x8x1xi32> to vector<1x8x1xi32>
    %81 = vector.broadcast %80 : vector<1x8x1xi32> to vector<1x8x256xi32>
    %82 = vector.broadcast %c8_i32 : i32 to vector<1x8x256xi32>
    %83 = arith.select %79, %81, %82 : vector<1x8x256xi1>, vector<1x8x256xi32>
    %cst_19 = arith.constant dense<2147483647> : vector<1x256xi32>
    %84 = vector.multi_reduction <minsi>, %83, %cst_19 [1] : vector<1x8x256xi32> to vector<1x256xi32>
    %85 = vector.shape_cast %84 : vector<1x256xi32> to vector<1x1x256xi32>
    %cst_20 = arith.constant 1.000000e+00 : f32
    %86 = vector.broadcast %cst_20 : f32 to vector<1x1x256xf32>
    %87 = arith.cmpf ogt, %75, %86 : vector<1x1x256xf32>
    %88 = vector.broadcast %24 : vector<1x8x1xi32> to vector<1x8x256xi32>
    %89 = vector.broadcast %85 : vector<1x1x256xi32> to vector<1x8x256xi32>
    %90 = arith.cmpi ne, %88, %89 : vector<1x8x256xi32>
    %91 = vector.broadcast %87 : vector<1x1x256xi1> to vector<1x8x256xi1>
    %92 = arith.andi %91, %90 : vector<1x8x256xi1>
    %cst_21 = arith.constant 0.000000e+00 : f32
    %93 = vector.broadcast %cst_21 : f32 to vector<1x8x256xf32>
    %94 = arith.select %92, %93, %73 : vector<1x8x256xi1>, vector<1x8x256xf32>
    %cst_22 = arith.constant dense<0.000000e+00> : vector<1x256xf32>
    %95 = vector.multi_reduction <add>, %94, %cst_22 [1] : vector<1x8x256xf32> to vector<1x256xf32>
    %96 = vector.shape_cast %95 : vector<1x256xf32> to vector<1x1x256xf32>
    %cst_23 = arith.constant 5.000000e-01 : f32
    %97 = vector.broadcast %cst_23 : f32 to vector<1x8x256xf32>
    %98 = arith.cmpf ogt, %94, %97 : vector<1x8x256xf32>
    %c8_i32_24 = arith.constant 8 : i32
    %99 = vector.shape_cast %24 : vector<1x8x1xi32> to vector<1x8x1xi32>
    %100 = vector.broadcast %99 : vector<1x8x1xi32> to vector<1x8x256xi32>
    %101 = vector.broadcast %c8_i32_24 : i32 to vector<1x8x256xi32>
    %102 = arith.select %98, %100, %101 : vector<1x8x256xi1>, vector<1x8x256xi32>
    %cst_25 = arith.constant dense<2147483647> : vector<1x256xi32>
    %103 = vector.multi_reduction <minsi>, %102, %cst_25 [1] : vector<1x8x256xi32> to vector<1x256xi32>
    %104 = vector.shape_cast %103 : vector<1x256xi32> to vector<1x1x256xi32>
    %c8_i32_26 = arith.constant 8 : i32
    %105 = vector.broadcast %c8_i32_26 : i32 to vector<1x1x256xi32>
    %106 = arith.cmpi eq, %104, %105 : vector<1x1x256xi32>
    %c0_i32 = arith.constant 0 : i32
    %107 = vector.broadcast %c0_i32 : i32 to vector<1x1x256xi32>
    %108 = arith.select %106, %107, %104 : vector<1x1x256xi1>, vector<1x1x256xi32>
    %109 = vector.broadcast %24 : vector<1x8x1xi32> to vector<1x8x256xi32>
    %110 = vector.broadcast %108 : vector<1x1x256xi32> to vector<1x8x256xi32>
    %111 = arith.cmpi eq, %109, %110 : vector<1x8x256xi32>
    %112 = arith.extui %111 : vector<1x8x256xi1> to vector<1x8x256xi32>
    %113 = arith.sitofp %112 : vector<1x8x256xi32> to vector<1x8x256xf32>
    %114 = vector.broadcast %5 : vector<1x8x1xf32> to vector<1x8x256xf32>
    %115 = arith.mulf %113, %114 : vector<1x8x256xf32>
    %cst_27 = arith.constant dense<0.000000e+00> : vector<1x256xf32>
    %116 = vector.multi_reduction <add>, %115, %cst_27 [1] : vector<1x8x256xf32> to vector<1x256xf32>
    %117 = vector.shape_cast %116 : vector<1x256xf32> to vector<1x1x256xf32>
    %118 = vector.broadcast %6 : vector<1x8x1xf32> to vector<1x8x256xf32>
    %119 = arith.mulf %113, %118 : vector<1x8x256xf32>
    %cst_28 = arith.constant dense<0.000000e+00> : vector<1x256xf32>
    %120 = vector.multi_reduction <add>, %119, %cst_28 [1] : vector<1x8x256xf32> to vector<1x256xf32>
    %121 = vector.shape_cast %120 : vector<1x256xf32> to vector<1x1x256xf32>
    %122 = vector.broadcast %7 : vector<1x8x1xf32> to vector<1x8x256xf32>
    %123 = arith.mulf %113, %122 : vector<1x8x256xf32>
    %cst_29 = arith.constant dense<0.000000e+00> : vector<1x256xf32>
    %124 = vector.multi_reduction <add>, %123, %cst_29 [1] : vector<1x8x256xf32> to vector<1x256xf32>
    %125 = vector.shape_cast %124 : vector<1x256xf32> to vector<1x1x256xf32>
    %126 = vector.broadcast %8 : vector<1x8x1xf32> to vector<1x8x256xf32>
    %127 = arith.mulf %113, %126 : vector<1x8x256xf32>
    %cst_30 = arith.constant dense<0.000000e+00> : vector<1x256xf32>
    %128 = vector.multi_reduction <add>, %127, %cst_30 [1] : vector<1x8x256xf32> to vector<1x256xf32>
    %129 = vector.shape_cast %128 : vector<1x256xf32> to vector<1x1x256xf32>
    %130 = arith.subf %117, %1 : vector<1x1x256xf32>
    %131 = arith.subf %121, %3 : vector<1x1x256xf32>
    %132 = tpu.concatenate %130, %131, %125, %129 in 1 : vector<1x1x256xf32>, vector<1x1x256xf32>, vector<1x1x256xf32>, vector<1x1x256xf32> -> vector<1x4x256xf32>
    %c0_31 = arith.constant 0 : index
    %c0_32 = arith.constant 0 : index
    %c0_33 = arith.constant 0 : index
    %133 = vector.load %arg5[%c0_31, %c0_32, %c0_33] : memref<1x4x256xf32, #tpu.memory_space<vmem>>, vector<1x4x256xf32>
    tpu.vector_store %arg5[%c0_31, %c0_32, %c0_33], %132 {strides = array<i32>} : memref<1x4x256xf32, #tpu.memory_space<vmem>>, vector<1x4x256xf32>,
    %c0_34 = arith.constant 0 : index
    %c0_35 = arith.constant 0 : index
    %c0_36 = arith.constant 0 : index
    %134 = vector.load %arg4[%c0_34, %c0_35, %c0_36] : memref<1x20x8xf32, #tpu.memory_space<vmem>>, vector<1x20x8xf32>
    "tpu.trace_start"() <{level = 10 : i32, message = "bcn,bng->bcg"}> : () -> ()
    %cst_37 = arith.constant dense<0.000000e+00> : vector<1x20x256xf32>
    %135 = tpu.matmul %134, %113, %cst_37 {dimension_numbers = #tpu.dot_dimension_numbers<[2], [1], [1], [2], [0, 0, 0, 1, 1, 2], [0], [0]>} : vector<1x20x8xf32>, vector<1x8x256xf32>, vector<1x20x256xf32> -> vector<1x20x256xf32>
    "tpu.trace_stop"() : () -> ()
    %c0_38 = arith.constant 0 : index
    %c0_39 = arith.constant 0 : index
    %c0_40 = arith.constant 0 : index
    %136 = vector.load %arg6[%c0_38, %c0_39, %c0_40] : memref<1x20x256xf32, #tpu.memory_space<vmem>>, vector<1x20x256xf32>
    tpu.vector_store %arg6[%c0_38, %c0_39, %c0_40], %135 {strides = array<i32>} : memref<1x20x256xf32, #tpu.memory_space<vmem>>, vector<1x20x256xf32>,
    %cst_41 = arith.constant 0.000000e+00 : f32
    %137 = vector.broadcast %cst_41 : f32 to vector<1x1x256xf32>
    %138 = arith.cmpf ogt, %96, %137 : vector<1x1x256xf32>
    %c0_42 = arith.constant 0 : index
    %139 = memref.load %arg1[%c0_42] : memref<6xf32, #tpu.memory_space<smem>>
    %c1_43 = arith.constant 1 : index
    %140 = memref.load %arg1[%c1_43] : memref<6xf32, #tpu.memory_space<smem>>
    %141 = vector.broadcast %139 : f32 to vector<1x1x256xf32>
    %142 = arith.divf %125, %141 : vector<1x1x256xf32>
    %143 = vector.broadcast %140 : f32 to vector<1x1x256xf32>
    %144 = arith.divf %129, %143 : vector<1x1x256xf32>
    %cst_44 = arith.constant 4.000000e+00 : f32
    %145 = vector.broadcast %cst_44 : f32 to vector<1x1x256xf32>
    %146 = arith.cmpf olt, %142, %145 : vector<1x1x256xf32>
    %cst_45 = arith.constant 1.000000e+00 : f32
    %147 = vector.broadcast %cst_45 : f32 to vector<1x1x256xf32>
    %148 = arith.divf %147, %142 : vector<1x1x256xf32>
    %cst_46 = arith.constant 4.000000e+00 : f32
    %149 = vector.broadcast %cst_46 : f32 to vector<1x1x256xf32>
    %150 = arith.cmpf olt, %148, %149 : vector<1x1x256xf32>
    %151 = arith.andi %146, %150 : vector<1x1x256xi1>
    %cst_47 = arith.constant 4.000000e+00 : f32
    %152 = vector.broadcast %cst_47 : f32 to vector<1x1x256xf32>
    %153 = arith.cmpf olt, %144, %152 : vector<1x1x256xf32>
    %154 = arith.andi %151, %153 : vector<1x1x256xi1>
    %cst_48 = arith.constant 1.000000e+00 : f32
    %155 = vector.broadcast %cst_48 : f32 to vector<1x1x256xf32>
    %156 = arith.divf %155, %144 : vector<1x1x256xf32>
    %cst_49 = arith.constant 4.000000e+00 : f32
    %157 = vector.broadcast %cst_49 : f32 to vector<1x1x256xf32>
    %158 = arith.cmpf olt, %156, %157 : vector<1x1x256xf32>
    %159 = arith.andi %154, %158 : vector<1x1x256xi1>
    %160 = arith.andi %138, %159 : vector<1x1x256xi1>
    %161 = arith.extui %160 : vector<1x1x256xi1> to vector<1x1x256xi32>
    %162 = arith.sitofp %161 : vector<1x1x256xi32> to vector<1x1x256xf32>
    %c2 = arith.constant 2 : index
    %163 = memref.load %arg1[%c2] : memref<6xf32, #tpu.memory_space<smem>>
    %c3 = arith.constant 3 : index
    %164 = memref.load %arg1[%c3] : memref<6xf32, #tpu.memory_space<smem>>
    %165 = vector.broadcast %163 : f32 to vector<1x1x256xf32>
    %166 = arith.divf %125, %165 : vector<1x1x256xf32>
    %167 = vector.broadcast %164 : f32 to vector<1x1x256xf32>
    %168 = arith.divf %129, %167 : vector<1x1x256xf32>
    %cst_50 = arith.constant 4.000000e+00 : f32
    %169 = vector.broadcast %cst_50 : f32 to vector<1x1x256xf32>
    %170 = arith.cmpf olt, %166, %169 : vector<1x1x256xf32>
    %cst_51 = arith.constant 1.000000e+00 : f32
    %171 = vector.broadcast %cst_51 : f32 to vector<1x1x256xf32>
    %172 = arith.divf %171, %166 : vector<1x1x256xf32>
    %cst_52 = arith.constant 4.000000e+00 : f32
    %173 = vector.broadcast %cst_52 : f32 to vector<1x1x256xf32>
    %174 = arith.cmpf olt, %172, %173 : vector<1x1x256xf32>
    %175 = arith.andi %170, %174 : vector<1x1x256xi1>
    %cst_53 = arith.constant 4.000000e+00 : f32
    %176 = vector.broadcast %cst_53 : f32 to vector<1x1x256xf32>
    %177 = arith.cmpf olt, %168, %176 : vector<1x1x256xf32>
    %178 = arith.andi %175, %177 : vector<1x1x256xi1>
    %cst_54 = arith.constant 1.000000e+00 : f32
    %179 = vector.broadcast %cst_54 : f32 to vector<1x1x256xf32>
    %180 = arith.divf %179, %168 : vector<1x1x256xf32>
    %cst_55 = arith.constant 4.000000e+00 : f32
    %181 = vector.broadcast %cst_55 : f32 to vector<1x1x256xf32>
    %182 = arith.cmpf olt, %180, %181 : vector<1x1x256xf32>
    %183 = arith.andi %178, %182 : vector<1x1x256xi1>
    %184 = arith.andi %138, %183 : vector<1x1x256xi1>
    %185 = arith.extui %184 : vector<1x1x256xi1> to vector<1x1x256xi32>
    %186 = arith.sitofp %185 : vector<1x1x256xi32> to vector<1x1x256xf32>
    %c4 = arith.constant 4 : index
    %187 = memref.load %arg1[%c4] : memref<6xf32, #tpu.memory_space<smem>>
    %c5 = arith.constant 5 : index
    %188 = memref.load %arg1[%c5] : memref<6xf32, #tpu.memory_space<smem>>
    %189 = vector.broadcast %187 : f32 to vector<1x1x256xf32>
    %190 = arith.divf %125, %189 : vector<1x1x256xf32>
    %191 = vector.broadcast %188 : f32 to vector<1x1x256xf32>
    %192 = arith.divf %129, %191 : vector<1x1x256xf32>
    %cst_56 = arith.constant 4.000000e+00 : f32
    %193 = vector.broadcast %cst_56 : f32 to vector<1x1x256xf32>
    %194 = arith.cmpf olt, %190, %193 : vector<1x1x256xf32>
    %cst_57 = arith.constant 1.000000e+00 : f32
    %195 = vector.broadcast %cst_57 : f32 to vector<1x1x256xf32>
    %196 = arith.divf %195, %190 : vector<1x1x256xf32>
    %cst_58 = arith.constant 4.000000e+00 : f32
    %197 = vector.broadcast %cst_58 : f32 to vector<1x1x256xf32>
    %198 = arith.cmpf olt, %196, %197 : vector<1x1x256xf32>
    %199 = arith.andi %194, %198 : vector<1x1x256xi1>
    %cst_59 = arith.constant 4.000000e+00 : f32
    %200 = vector.broadcast %cst_59 : f32 to vector<1x1x256xf32>
    %201 = arith.cmpf olt, %192, %200 : vector<1x1x256xf32>
    %202 = arith.andi %199, %201 : vector<1x1x256xi1>
    %cst_60 = arith.constant 1.000000e+00 : f32
    %203 = vector.broadcast %cst_60 : f32 to vector<1x1x256xf32>
    %204 = arith.divf %203, %192 : vector<1x1x256xf32>
    %cst_61 = arith.constant 4.000000e+00 : f32
    %205 = vector.broadcast %cst_61 : f32 to vector<1x1x256xf32>
    %206 = arith.cmpf olt, %204, %205 : vector<1x1x256xf32>
    %207 = arith.andi %202, %206 : vector<1x1x256xi1>
    %208 = arith.andi %138, %207 : vector<1x1x256xi1>
    %209 = arith.extui %208 : vector<1x1x256xi1> to vector<1x1x256xi32>
    %210 = arith.sitofp %209 : vector<1x1x256xi32> to vector<1x1x256xf32>
    %211 = tpu.concatenate %162, %186, %210 in 1 : vector<1x1x256xf32>, vector<1x1x256xf32>, vector<1x1x256xf32> -> vector<1x3x256xf32>
    %212 = arith.fptosi %211 : vector<1x3x256xf32> to vector<1x3x256xi8>
    %c0_62 = arith.constant 0 : index
    %c0_63 = arith.constant 0 : index
    %c0_64 = arith.constant 0 : index
    %213 = vector.load %arg7[%c0_62, %c0_63, %c0_64] : memref<1x3x256xi8, #tpu.memory_space<vmem>>, vector<1x3x256xi8>
    tpu.vector_store %arg7[%c0_62, %c0_63, %c0_64], %212 {strides = array<i32>} : memref<1x3x256xi8, #tpu.memory_space<vmem>>, vector<1x3x256xi8>,
    return
  }
  func.func @transform_0(%arg0: i32) -> i32 {
    %c0_i32 = arith.constant 0 : i32
    %c0_i32_0 = arith.constant 0 : i32
    return %c0_i32 : i32
  }
  func.func @transform_1(%arg0: i32) -> (i32, i32) {
    %c0_i32 = arith.constant 0 : i32
    %c0_i32_0 = arith.constant 0 : i32
    %c0_i32_1 = arith.constant 0 : i32
    return %c0_i32, %c0_i32_0 : i32, i32
  }
  func.func @transform_2(%arg0: i32) -> (i32, i32, i32) {
    %c0_i32 = arith.constant 0 : i32
    %c0_i32_0 = arith.constant 0 : i32
    %c0_i32_1 = arith.constant 0 : i32
    return %arg0, %c0_i32, %c0_i32_0 : i32, i32, i32
  }
  func.func @transform_3(%arg0: i32) -> (i32, i32, i32) {
    %c0_i32 = arith.constant 0 : i32
    %c0_i32_0 = arith.constant 0 : i32
    %c0_i32_1 = arith.constant 0 : i32
    return %arg0, %c0_i32, %c0_i32_0 : i32, i32, i32
  }
  func.func @transform_4(%arg0: i32) -> (i32, i32, i32) {
    %c0_i32 = arith.constant 0 : i32
    %c0_i32_0 = arith.constant 0 : i32
    %c0_i32_1 = arith.constant 0 : i32
    return %arg0, %c0_i32, %c0_i32_0 : i32, i32, i32
  }
  func.func @transform_5(%arg0: i32) -> (i32, i32, i32) {
    %c0_i32 = arith.constant 0 : i32
    %c0_i32_0 = arith.constant 0 : i32
    %c0_i32_1 = arith.constant 0 : i32
    return %arg0, %c0_i32, %c0_i32_0 : i32, i32, i32
  }
  func.func @transform_6(%arg0: i32) -> (i32, i32, i32) {
    %c0_i32 = arith.constant 0 : i32
    %c0_i32_0 = arith.constant 0 : i32
    %c0_i32_1 = arith.constant 0 : i32
    return %arg0, %c0_i32, %c0_i32_0 : i32, i32, i32
  }
}

</mosaic_0001>

<bundles_post_ra>
// kernel: task_nearest_assigner.1
= control target key start
LH: loop header
LB: loop body
LE: loop exit
PB: predicated region body
PF: predicated region fallthrough
CT: control target
= control target key end

     0   :  { %12 = vsyncpa [#allocation3], 0  ;;  %s1243_s21 = smov 0   ;;  %s1511_s0 = inlined_call_operand.vmem [shape: f32[6], index: 0, kind: input, shape index: {}]   ;;  %s1512_s1 = inlined_call_operand.vmem [shape: f32[2,256], index: 1, kind: input, shape index: {}]   ;;  %s1513_s2 = inlined_call_operand.vmem [shape: f32[2,8,8], index: 2, kind: input, shape index: {}]   ;;  %s1514_s3 = inlined_call_operand.vmem [shape: f32[2,20,8], index: 3, kind: input, shape index: {}]   ;;  %s1515_s4 = inlined_call_operand.vmem [shape: f32[2,4,256], index: 4, kind: output, shape index: {0}]   ;;  %s1516_s5 = inlined_call_operand.vmem [shape: f32[2,20,256], index: 5, kind: output, shape index: {1}]   ;;  %s1517_s6 = inlined_call_operand.vmem [shape: s8[2,3,256], index: 6, kind: output, shape index: {2}]  }
   0x1 LB: > { %s1059_s22 = sadd.s32 4294967295, %s1197_s21   ;;  %p1061_p0 = scmp.ge.s32.totalorder %s1197_s21, 1  ;;  %s1197_s21 = sphi %s1243_s21, %s18_s21  }
   0x2   : > { %p195_p1 = scmp.lt.s32.totalorder %s1197_s21, 3  ;;  %s208_s25 = sshll.u32 %s1511_s0, 4  ;;  %s209_s25 = int_to_ptr.vmem [resolvable:$true] %s208_s25 }
   0x3   : > { %p1111_p3 = scmp.eq.s32.totalorder %s1059_s22, 0  ;;  %s1172_s27 = scalar_lea.vmem %s209_s25, 16 }
   0x4   : > { %p1254_p2 = pnand %p1061_p0, %p195_p1  ;;  %p1173_p6 = scmp.ne.s32.totalorder %s209_s25, %s1172_s27 }
   0x5   : > { %p1180_p10 = scmp.lt.s32.totalorder %s209_s25, %s209_s25  ;;  %p1181_p11 = scmp.lt.s32.totalorder %s1172_s27, %s1172_s27 }
   0x6   : > { %p1107_p4 = pneg %p1254_p2 }
   0x7   : > { %p1182_p12 = por %p1181_p11, %p1180_p10 }
   0x8   : > { %p1108_p5 = pnand %p1111_p3, %p1107_p4 }
   0xa   : > { %p1174_p7 = pneg %p1108_p5 }
   0xc   : > { %p1175_p8 = pnand %p1174_p7, %p1173_p6 }
   0xe   : > { %p1176_p9 = pneg %p1175_p8 }
  0x10   : > { %p1183_p13 = pnand %p1182_p12, %p1176_p9 }
  0x12   : > { %1186 = shalt.err (!%p1183_p13)
}
  0x13   : > { %s1199_s28 = smov [#allocation2]   ;;  %239 = sbr.rel (%p1254_p2) target bundleno = 1699 (0x6a3), region = 36 }
  0x14   : > { %1110 = dma.vmem_to_smem (!%p1108_p5), %s209_s25, 16, %s1199_s28, [#allocation3]  }
  0x18   : > { %1192 = dma.done.wait (%p1111_p3), [#allocation3], 16  }
  0x19   : > { %1194 = vsyncadd (%p1111_p3), [#allocation3], 4294967280 }
  0x1a   : > { %245 = sfence }
  0x1b   : > { %p283_p0 = scmp.lt.s32.totalorder %s1059_s22, 1  ;;  %v312_v0 = vlaneseq  ;;  %v1200_v1 = vmov 0   ;;  %v1284_v5 = vld [vmem:[%s1512_s1] ss:$2 sm:$0x3]  ;;  %v1201_v12 = vmov 1  }
  0x1c   : > { %1130 = vset.pattern.permute.xlu0 %v1200_v1  ;;  %v1295_v9 = vld [vmem:[%s1512_s1 + $0x1] ss:$2 sm:$0x3]  ;;  %v310_v13 = vadd.f32 0.5, %v1284_v5  ;;  %s1080_s13 = sld [smem:[#allocation2 + $0x1]] }
  0x1d   : > { %s1539_s22 = smov (!%p283_p0, %s1059_s22), 1  ;;  %v1267_v2 = vshrl.u32 %v312_v0, 7  ;;  %v331_v14 = vadd.f32 0.5, %v1295_v9  ;;  %v1323_v32 = vand.u32 127, %v312_v0  ;;  %s763_s14 = sld [smem:[#allocation2]] }
  0x1e   : > { %s1066_s29 = sshll.u32 %s1539_s22, 3  ;;  %s1398_s15 = sld [smem:[#allocation2 + $0x2]] }
  0x1f   : > { %v1271_v3 = vsub.s32 0, %v1267_v2  ;;  %v1274_v4 = vsub.s32 1, %v1267_v2  ;;  %s286_s8 = scalar_lea.vmem %s1513_s2, %s1066_s29  ;;  %v1326_v33 = vadd.s32 128, %v1323_v32  ;;  %s1400_s16 = sld [smem:[#allocation2 + $0x3]] }
  0x20   : > { %v1286_v6 = vld [vmem:[%s286_s8] sm:$0xff]  ;;  %s1097_s17 = smul.u32 24, %s1539_s22  ;;  %s1420_s23 = sld [smem:[#allocation2 + $0x4]] }
  0x21   : > { %v617_v7 = vrot.slane %v1284_v5, %v1271_v3  ;;  %v621_v8 = vrot.slane %v1284_v5, %v1274_v4  ;;  %324 = vperm.xlu0 %1130, %v1286_v6   ;;  %v630_v10 = vrot.slane %v1295_v9, %v1271_v3  ;;  %v634_v11 = vrot.slane %v1295_v9, %v1274_v4  ;;  %s1427_s24 = sld [smem:[#allocation2 + $0x5]]  ;;  %s296_s27 = scalar_lea.vmem %s1515_s4, %s1066_s29 }
  0x22   : > { %v315_v15 = vrot.slane %v310_v13, %v1271_v3  ;;  %v319_v16 = vrot.slane %v310_v13, %v1274_v4  ;;  %v336_v18 = vrot.slane %v331_v14, %v1271_v3  ;;  %v340_v19 = vrot.slane %v331_v14, %v1274_v4  ;;  %s1406_s20 = scalar_lea.vmem %s1514_s3, %s1097_s17  ;;  %s1071_s28 = sshll.u32 %s1539_s22, 1 }
  0x23   : > { %s305_s7 = scalar_lea.vmem %s1517_s6, %s1071_s28  ;;  %s1098_s8 = smul.u32 48, %s1539_s22 }
  0x25   : > { %1131 = vset.pattern.permute.xlu0 %v1201_v12  ;;  %s301_s11 = scalar_lea.vmem %s1516_s5, %s1098_s8 }
  0x26   : > { %344 = vperm.xlu0 %1131, %v1286_v6  }
  0x9c   : > { %v1307_v17 = vpop.permute.xlu0 %324 }
  0x9d   : > { %v327_v20 = vsub.f32 %v315_v15, %v1307_v17  ;;  %v328_v21 = vsub.f32 %v319_v16, %v1307_v17 }
  0x9f   : > { %v329_v25 = vand.u32 2147483647, %v327_v20  ;;  %v330_v26 = vand.u32 2147483647, %v328_v21 }
  0xa1   : > { %v1313_v22 = vpop.permute.xlu0 %344 }
  0xa2   : > { %v347_v23 = vsub.f32 %v336_v18, %v1313_v22  ;;  %v348_v24 = vsub.f32 %v340_v19, %v1313_v22 }
  0xa4   : > { %v349_v27 = vand.u32 2147483647, %v347_v23  ;;  %v350_v28 = vand.u32 2147483647, %v348_v24  ;;  %v1202_v24 = vmov 4  }
  0xa5   : > { %1132 = vset.pattern.permute.xlu1 %v1202_v24 }
  0xa6   : > { %v1317_v29 = vadd.f32 %v349_v27, %v329_v25  ;;  %v1319_v30 = vadd.f32 %v350_v28, %v330_v26  ;;  %v1203_v25 = vmov 2   ;;  %v1204_v26 = vmov 3  }
  0xa7   : > { %1133 = vset.pattern.permute.xlu0 %v1203_v25 }
  0xa8   : > { %v358_v31 = vmin.f32 %v1317_v29, %v1319_v30 }
  0xaa   : > { %359 = vmin.xlane.f32.xlu1 %v358_v31 }
 0x133   : > { %v360_v34 = vpop.xlane.xlu1 %359 }
 0x134   : > { %vm361_vm0 = vcmp.eq.f32.partialorder %v1317_v29, %v360_v34  ;;  %vm362_vm1 = vcmp.eq.f32.partialorder %v1319_v30, %v360_v34 }
 0x135   : > { %v363_v35 = vsel %vm361_vm0, %v1323_v32, 256  ;;  %v364_v36 = vsel %vm362_vm1, %v1326_v33, 256 }
 0x136   : > { %vm365_vm2 = vcmp.lt.s32.totalorder %v363_v35, %v364_v36 }
 0x137   : > { %v366_v37 = vsel %vm365_vm2, %v363_v35, %v364_v36  ;;  %v1205_v35 = vmov 0.0   ;;  %v465_v36 = vrot.slane %v1319_v30, 4 }
 0x138   : > { %v368_v38 = vshra.s32 %v366_v37, 16  ;;  %v367_v40 = vand.u32 65535, %v366_v37  ;;  %742 = vmatprep.mubr.f32.mxu1 %v1205_v35  ;;  %736 = vmatprep.mubr.f32.mxu0 %v1205_v35  ;;  %v459_v37 = vrot.slane %v1317_v29, 4 }
 0x13a   : > { %v370_v39 = vcvt.s32.f32 %v368_v38  ;;  %v369_v42 = vcvt.s32.f32 %v367_v40  ;;  %v466_v38 = vmin.f32 %v1319_v30, %v465_v36 }
 0x13c   : > { %371 = vmin.xlane.f32.xlu1 %v370_v39  ;;  %v467_v40 = vrot.slane %v466_v38, 2 }
 0x1c5   : > { %v372_v41 = vpop.xlane.xlu1 %371 }
 0x1c6   : > { %vm373_vm3 = vcmp.eq.f32.partialorder %v370_v39, %v372_v41  ;;  %v378_v44 = vcvt.f32.s32 %v372_v41  ;;  %v460_v39 = vmin.f32 %v1317_v29, %v459_v37 }
 0x1c7   : > { %v374_v43 = vsel %vm373_vm3, %v369_v42, inf  ;;  %v468_v42 = vmin.f32 %v466_v38, %v467_v40 }
 0x1c8   : > { %375 = vmin.xlane.f32.xlu1 %v374_v43  ;;  %v379_v46 = vshll.u32 %v378_v44, 16  ;;  %v461_v41 = vrot.slane %v460_v39, 2 }
 0x1c9   : > { %v469_v44 = vrot.slane %v468_v42, 1 }
 0x1ca   : > { %v462_v43 = vmin.f32 %v460_v39, %v461_v41 }
 0x251   : > { %v376_v45 = vpop.xlane.xlu1 %375 }
 0x252   : > { %v377_v47 = vcvt.f32.s32 %v376_v45  ;;  %v463_v45 = vrot.slane %v462_v43, 1 }
 0x254   : > { %v1332_v48 = vadd.s32 %v379_v46, %v377_v47  ;;  %v464_v46 = vmin.f32 %v462_v43, %v463_v45 }
 0x256   : > { %vm381_vm4 = vcmp.eq.s32.totalorder %v1323_v32, %v1332_v48  ;;  %vm382_vm5 = vcmp.eq.s32.totalorder %v1326_v33, %v1332_v48  ;;  %vm471_vm1 = vcmp.eq.f32.partialorder %v1317_v29, %v464_v46 }
 0x257   : > { %v383_v49 = vsel %vm381_vm4, 1e+30, %v1317_v29  ;;  %v384_v50 = vsel %vm382_vm5, 1e+30, %v1319_v30 }
 0x258   : > { %v385_v51 = vmin.f32 %v383_v49, %v384_v50 }
 0x25a   : > { %386 = vmin.xlane.f32.xlu0 %v385_v51 }
 0x270   : > { %578 = vperm.xlu0 %1133, %v1286_v6  }
 0x274   : > { %1135 = vset.pattern.permute.xlu0 %v1204_v26 }
 0x2e3   : > { %v387_v52 = vpop.xlane.xlu0 %386 }
 0x2e4   : > { %vm388_vm6 = vcmp.eq.f32.partialorder %v383_v49, %v387_v52  ;;  %vm389_vm7 = vcmp.eq.f32.partialorder %v384_v50, %v387_v52 }
 0x2e5   : > { %v390_v53 = vsel %vm388_vm6, %v1323_v32, 256  ;;  %v391_v54 = vsel %vm389_vm7, %v1326_v33, 256 }
 0x2e6   : > { %vm392_vm8 = vcmp.lt.s32.totalorder %v390_v53, %v391_v54 }
 0x2e7   : > { %v393_v55 = vsel %vm392_vm8, %v390_v53, %v391_v54 }
 0x2e8   : > { %v395_v56 = vshra.s32 %v393_v55, 16  ;;  %v394_v58 = vand.u32 65535, %v393_v55 }
 0x2ea   : > { %v397_v57 = vcvt.s32.f32 %v395_v56  ;;  %v396_v60 = vcvt.s32.f32 %v394_v58 }
 0x2ec   : > { %398 = vmin.xlane.f32.xlu1 %v397_v57 }
 0x375   : > { %v399_v59 = vpop.xlane.xlu1 %398 }
 0x376   : > { %vm400_vm9 = vcmp.eq.f32.partialorder %v397_v57, %v399_v59  ;;  %v405_v62 = vcvt.f32.s32 %v399_v59 }
 0x377   : > { %v401_v61 = vsel %vm400_vm9, %v396_v60, inf }
 0x378   : > { %402 = vmin.xlane.f32.xlu1 %v401_v61  ;;  %v406_v0 = vshll.u32 %v405_v62, 16 }
 0x401   : > { %v403_v63 = vpop.xlane.xlu1 %402 }
 0x402   : > { %v404_v1 = vcvt.f32.s32 %v403_v63 }
 0x404   : > { %v1348_v12 = vadd.s32 %v406_v0, %v404_v1 }
 0x406   : > { %vm408_vm10 = vcmp.eq.s32.totalorder %v1323_v32, %v1348_v12  ;;  %vm409_vm11 = vcmp.eq.s32.totalorder %v1326_v33, %v1348_v12 }
 0x407   : > { %v412_v13 = vsel %vm408_vm10, 1e+30, %v383_v49  ;;  %v413_v14 = vsel %vm409_vm11, 1e+30, %v384_v50  ;;  %v473_v49 = vsel %vm471_vm1, %v1267_v2, 8  ;;  %vm411_vm6 = vmor %vm382_vm5, %vm409_vm11 }
 0x408   : > { %v414_v15 = vmin.f32 %v412_v13, %v413_v14  ;;  %v475_v51 = vrot.slane %v473_v49, 4 }
 0x40a   : > { %415 = vmin.xlane.f32.xlu1 %v414_v15  ;;  %vm476_vm3 = vcmp.lt.s32.totalorder %v473_v49, %v475_v51 }
 0x40b   : > { %v477_v54 = vsel %vm476_vm3, %v473_v49, %v475_v51 }
 0x40c   : > { %v478_v59 = vrot.slane %v477_v54, 2 }
 0x493   : > { %v416_v16 = vpop.xlane.xlu1 %415 }
 0x494   : > { %vm417_vm12 = vcmp.eq.f32.partialorder %v412_v13, %v416_v16  ;;  %vm418_vm13 = vcmp.eq.f32.partialorder %v413_v14, %v416_v16 }
 0x495   : > { %v419_v18 = vsel %vm417_vm12, %v1323_v32, 256  ;;  %v420_v19 = vsel %vm418_vm13, %v1326_v33, 256  ;;  %vm479_vm12 = vcmp.lt.s32.totalorder %v477_v54, %v478_v59  ;;  %vm410_vm13 = vmor %vm381_vm4, %vm408_vm10 }
 0x496   : > { %vm421_vm14 = vcmp.lt.s32.totalorder %v419_v18, %v420_v19  ;;  %v480_v62 = vsel %vm479_vm12, %v477_v54, %v478_v59  ;;  %v579_v54 = vpop.permute.xlu0 %578  ;;  %v659_v59 = vld [vmem:[%s1406_s20] sm:$0xff] }
 0x497   : > { %v422_v20 = vsel %vm421_vm14, %v419_v18, %v420_v19  ;;  %v481_v15 = vrot.slane %v480_v62, 1 }
 0x498   : > { %v424_v21 = vshra.s32 %v422_v20, 16  ;;  %v423_v27 = vand.u32 65535, %v422_v20 }
 0x499   : > { %vm482_vm11 = vcmp.lt.s32.totalorder %v480_v62, %v481_v15 }
 0x49a   : > { %v426_v23 = vcvt.s32.f32 %v424_v21  ;;  %v425_v31 = vcvt.s32.f32 %v423_v27  ;;  %v483_v21 = vsel %vm482_vm11, %v480_v62, %v481_v15 }
 0x49c   : > { %427 = vmin.xlane.f32.xlu1 %v426_v23 }
 0x525   : > { %v428_v28 = vpop.xlane.xlu1 %427 }
 0x526   : > { %vm429_vm15 = vcmp.eq.f32.partialorder %v426_v23, %v428_v28  ;;  %v434_v52 = vcvt.f32.s32 %v428_v28 }
 0x527   : > { %v430_v34 = vsel %vm429_vm15, %v425_v31, inf }
 0x528   : > { %431 = vmin.xlane.f32.xlu1 %v430_v34  ;;  %v435_v57 = vshll.u32 %v434_v52, 16 }
 0x539   : > { %442 = vperm.xlu1 %1132, %v1286_v6  }
 0x53d   : > { %1134 = vset.pattern.permute.xlu1 %v1204_v26 }
 0x53e   : > { %596 = vperm.xlu1 %1134, %v1286_v6   ;;  %v470_v6 = vmin.f32 %v468_v42, %v469_v44 }
 0x540   : > { %vm472_vm0 = vcmp.eq.f32.partialorder %v1319_v30, %v470_v6  ;;  %v769_v6 = vstv %s1080_s13 }
 0x541   : > { %v474_v47 = vsel %vm472_vm0, %v1267_v2, 8  ;;  %vm495_vm0 = vcmp.ne.s32.totalorder %v1267_v2, %v483_v21  ;;  %1136 = vrcp.f32 %v769_v6 }
 0x542   : > { %v484_v50 = vrot.slane %v474_v47, 4 }
 0x544   : > { %vm485_vm2 = vcmp.lt.s32.totalorder %v474_v47, %v484_v50 }
 0x545   : > { %v486_v53 = vsel %vm485_vm2, %v474_v47, %v484_v50  ;;  %v765_v47 = vstv %s763_s14  ;;  %v803_v50 = vstv %s1398_s15 }
 0x546   : > { %v487_v56 = vrot.slane %v486_v53, 2  ;;  %1138 = vrcp.f32 %v765_v47 }
 0x547   : > { %1140 = vrcp.f32 %v803_v50 }
 0x548   : > { %vm488_vm7 = vcmp.lt.s32.totalorder %v486_v53, %v487_v56 }
 0x549   : > { %v489_v30 = vsel %vm488_vm7, %v486_v53, %v487_v56 }
 0x54a   : > { %v490_v13 = vrot.slane %v489_v30, 1 }
 0x54c   : > { %vm491_vm5 = vcmp.lt.s32.totalorder %v489_v30, %v490_v13 }
 0x54d   : > { %v492_v48 = vsel %vm491_vm5, %v489_v30, %v490_v13 }
 0x54e   : > { %vm496_vm4 = vcmp.ne.s32.totalorder %v1267_v2, %v492_v48 }
 0x5b1   : > { %v432_v55 = vpop.xlane.xlu1 %431 }
 0x5b2   : > { %v433_v58 = vcvt.f32.s32 %v432_v55  ;;  %v660_v55 = vld [vmem:[%s1406_s20 + $0x8] sm:$0xff] }
 0x5b4   : > { %v436_v60 = vadd.s32 %v435_v57, %v433_v58  ;;  %v1206_v57 = vmov 1.0   ;;  %v807_v58 = vstv %s1400_s16 }
 0x5b5   : > { %v443_v29 = vpop.permute.xlu1 %442  ;;  %1142 = vrcp.f32 %v807_v58 }
 0x5b6   : > { %vm437_vm8 = vcmp.eq.s32.totalorder %v1323_v32, %v436_v60  ;;  %vm438_vm9 = vcmp.eq.s32.totalorder %v1326_v33, %v436_v60 }
 0x5b7   : > { %vm440_vm14 = vmor %vm411_vm6, %vm438_vm9 }
 0x5b8   : > { %vm439_vm15 = vmor %vm410_vm13, %vm437_vm8  ;;  %v446_v61 = vsel %vm440_vm14, %v443_v29, 0.0 }
 0x5b9   : > { %v445_v63 = vsel %vm439_vm15, %v443_v29, 0.0  ;;  %v453_v0 = vrot.slane %v446_v61, 4  ;;  %v597_v52 = vpop.permute.xlu1 %596 }
 0x5ba   : > { %v447_v1 = vrot.slane %v445_v63, 4 }
 0x5bb   : > { %v454_v14 = vadd.f32 %v453_v0, %v446_v61 }
 0x5bc   : > { %v448_v33 = vadd.f32 %v447_v1, %v445_v63 }
 0x5bd   : > { %v455_v16 = vrot.slane %v454_v14, 2 }
 0x5be   : > { %v449_v18 = vrot.slane %v448_v33, 2 }
 0x5bf   : > { %v456_v12 = vadd.f32 %v455_v16, %v454_v14  ;;  %v661_v16 = vld [vmem:[%s1406_s20 + $0x10] sm:$0xf] }
 0x5c0   : > { %v450_v19 = vadd.f32 %v449_v18, %v448_v33 }
 0x5c1   : > { %v457_v32 = vrot.slane %v456_v12, 1 }
 0x5c2   : > { %v451_v20 = vrot.slane %v450_v19, 1 }
 0x5c3   : > { %v458_v23 = vadd.f32 %v457_v32, %v456_v12 }
 0x5c4   : > { %v452_v24 = vadd.f32 %v451_v20, %v450_v19 }
 0x5c5   : > { %vm494_vm10 = vcmp.gt.f32.partialorder %v458_v23, 1.0 }
 0x5c6   : > { %vm493_vm1 = vcmp.gt.f32.partialorder %v452_v24, 1.0  ;;  %vm502_vm2 = vmand %vm494_vm10, %vm496_vm4  ;;  %vm662_vm10 = vcmask 64512  }
 0x5c7   : > { %vm501_vm3 = vmand %vm493_vm1, %vm495_vm0  ;;  %v1391_v25 = vsel %vm502_vm2, 0.0, %v446_v61  ;;  %vm1519_vm1 = vcmask 1040384   ;;  %vm1518_vm2 = vcmask 1041408  }
 0x5c8   : > { %v503_v26 = vsel %vm501_vm3, 0.0, %v445_v63  ;;  %vm518_vm6 = vcmp.gt.f32.partialorder %v1391_v25, 0.5  ;;  %vm651_vm3 = vcmask 1042432  }
 0x5c9   : > { %v505_v27 = vrot.slane %v503_v26, 4  ;;  %vm517_vm7 = vcmp.gt.f32.partialorder %v503_v26, 0.5  ;;  %v520_v28 = vsel %vm518_vm6, %v1267_v2, 8 }
 0x5ca   : > { %v519_v31 = vsel %vm517_vm7, %v1267_v2, 8  ;;  %v530_v34 = vrot.slane %v520_v28, 4 }
 0x5cb   : > { %v1396_v36 = vadd.f32 %v505_v27, %v503_v26  ;;  %v521_v37 = vrot.slane %v519_v31, 4 }
 0x5cc   : > { %vm531_vm8 = vcmp.lt.s32.totalorder %v520_v28, %v530_v34 }
 0x5cd   : > { %vm522_vm9 = vcmp.lt.s32.totalorder %v519_v31, %v521_v37  ;;  %v532_v38 = vsel %vm531_vm8, %v520_v28, %v530_v34 }
 0x5ce   : > { %v523_v39 = vsel %vm522_vm9, %v519_v31, %v521_v37  ;;  %v533_v40 = vrot.slane %v532_v38, 2 }
 0x5cf   : > { %v524_v41 = vrot.slane %v523_v39, 2 }
 0x5d0   : > { %vm534_vm12 = vcmp.lt.s32.totalorder %v532_v38, %v533_v40 }
 0x5d1   : > { %vm525_vm13 = vcmp.lt.s32.totalorder %v523_v39, %v524_v41  ;;  %v535_v42 = vsel %vm534_vm12, %v532_v38, %v533_v40 }
 0x5d2   : > { %v536_v43 = vrot.slane %v535_v42, 1  ;;  %v526_v44 = vsel %vm525_vm13, %v523_v39, %v524_v41 }
 0x5d3   : > { %v527_v45 = vrot.slane %v526_v44, 1 }
 0x5d4   : > { %vm537_vm14 = vcmp.lt.s32.totalorder %v535_v42, %v536_v43 }
 0x5d5   : > { %v538_v46 = vsel %vm537_vm14, %v535_v42, %v536_v43  ;;  %vm528_vm15 = vcmp.lt.s32.totalorder %v526_v44, %v527_v45 }
 0x5d6   : > { %vm540_vm5 = vcmp.eq.s32.totalorder %v538_v46, 8  ;;  %v529_v49 = vsel %vm528_vm15, %v526_v44, %v527_v45 }
 0x5d7   : > { %v542_v51 = vsel %vm540_vm5, 0, %v538_v46  ;;  %vm539_vm11 = vcmp.eq.s32.totalorder %v529_v49, 8 }
 0x5d8   : > { %vm544_vm4 = vcmp.eq.s32.totalorder %v1267_v2, %v542_v51  ;;  %v541_v53 = vsel %vm539_vm11, 0, %v529_v49  ;;  %v1137_v49 = vpop.eup %1136 }
 0x5d9   : > { %v1074_v56 = vsel %vm544_vm4, 1.0, %v1205_v35  ;;  %1075 = vmatprep.subr.msk.mxu0 %vm544_vm4, %v1206_v57  ;;  %1095 = vmatprep.subr.msk.mxu1 %vm544_vm4, %v1206_v57  ;;  %vm543_vm0 = vcmp.eq.s32.totalorder %v1267_v2, %v541_v53  ;;  %v1139_v53 = vpop.eup %1138 }
 0x5da   : > { %v550_v60 = vmul.f32 %v1074_v56, %v1307_v17  ;;  %v564_v29 = vmul.f32 %v1074_v56, %v1313_v22  ;;  %v1073_v30 = vsel %vm543_vm0, 1.0, %v1205_v35  ;;  %v600_v61 = vmul.f32 %v1074_v56, %v597_v52  ;;  %1076 = vmatpush1.msk.msra.mxu0 %vm543_vm0, %v1206_v57  ;;  %1096 = vmatpush1.msk.msra.mxu1 %vm543_vm0, %v1206_v57 }
 0x5db   : > { %v549_v62 = vmul.f32 %v1073_v30, %v1307_v17  ;;  %v563_v63 = vmul.f32 %v1073_v30, %v1313_v22  ;;  %v599_v0 = vmul.f32 %v1073_v30, %v597_v52  ;;  %v581_v1 = vmul.f32 %v1073_v30, %v579_v54  ;;  %1078 = vmatmul.mubr.msk.f32.vlgmr.msra.gmra.mxu1 %vm662_vm10, %v660_v55 }
 0x5dc   : > { %v557_v13 = vrot.slane %v550_v60, 4  ;;  %v571_v14 = vrot.slane %v564_v29, 4  ;;  %v607_v15 = vrot.slane %v600_v61, 4  ;;  %v582_v33 = vmul.f32 %v1074_v56, %v579_v54  ;;  %1077 = vmatmul.mubr.msk.f32.vlgmr.msra.gmra.mxu0 %vm662_vm10, %v659_v59  ;;  %748 = vmatprep.mubr.f32.mxu1 %v1205_v35  ;;  %v1141_v59 = vpop.eup %1140 }
 0x5dd   : > { %v551_v18 = vrot.slane %v549_v62, 4  ;;  %v565_v12 = vrot.slane %v563_v63, 4  ;;  %v601_v17 = vrot.slane %v599_v0, 4  ;;  %v583_v19 = vrot.slane %v581_v1, 4 }
 0x5de   : > { %v558_v22 = vadd.f32 %v557_v13, %v550_v60  ;;  %v572_v32 = vadd.f32 %v571_v14, %v564_v29  ;;  %v608_v48 = vadd.f32 %v607_v15, %v600_v61  ;;  %v589_v20 = vrot.slane %v582_v33, 4 }
 0x5df   : > { %v552_v21 = vadd.f32 %v551_v18, %v549_v62  ;;  %v566_v23 = vadd.f32 %v565_v12, %v563_v63  ;;  %v602_v24 = vadd.f32 %v601_v17, %v599_v0  ;;  %v584_v26 = vadd.f32 %v583_v19, %v581_v1  ;;  %1079 = vmatmul.mubr.msk.f32.gmra.mxu1 %vm662_vm10, %v661_v16 }
 0x5e0   : > { %v559_v27 = vrot.slane %v558_v22, 2  ;;  %v573_v28 = vrot.slane %v572_v32, 2  ;;  %v609_v31 = vrot.slane %v608_v48, 2  ;;  %v590_v34 = vadd.f32 %v589_v20, %v582_v33 }
 0x5e1   : > { %v553_v37 = vrot.slane %v552_v21, 2  ;;  %v567_v38 = vrot.slane %v566_v23, 2  ;;  %v603_v39 = vrot.slane %v602_v24, 2  ;;  %v585_v40 = vrot.slane %v584_v26, 2 }
 0x5e2   : > { %v560_v41 = vadd.f32 %v559_v27, %v558_v22  ;;  %v574_v42 = vadd.f32 %v573_v28, %v572_v32  ;;  %v610_v43 = vadd.f32 %v609_v31, %v608_v48  ;;  %v591_v44 = vrot.slane %v590_v34, 2 }
 0x5e3   : > { %v554_v45 = vadd.f32 %v553_v37, %v552_v21  ;;  %v568_v6 = vadd.f32 %v567_v38, %v566_v23  ;;  %v604_v46 = vadd.f32 %v603_v39, %v602_v24  ;;  %v586_v47 = vadd.f32 %v585_v40, %v584_v26  ;;  %v1143_v26 = vpop.eup %1142 }
 0x5e4   : > { %v561_v50 = vrot.slane %v560_v41, 1  ;;  %v575_v51 = vrot.slane %v574_v42, 1  ;;  %v841_v52 = vstv %s1420_s23  ;;  %v592_v57 = vadd.f32 %v591_v44, %v590_v34 }
 0x5e5   : > { %v555_v54 = vrot.slane %v554_v45, 1  ;;  %v569_v55 = vrot.slane %v568_v6, 1  ;;  %v587_v56 = vrot.slane %v586_v47, 1  ;;  %v605_v30 = vrot.slane %v604_v46, 1 }
 0x5e6   : > { %v562_v60 = vadd.f32 %v561_v50, %v560_v41  ;;  %v576_v29 = vadd.f32 %v575_v51, %v574_v42  ;;  %v611_v63 = vrot.slane %v610_v43, 1  ;;  %1144 = vrcp.f32 %v841_v52 }
 0x5e7   : > { %v556_v61 = vadd.f32 %v555_v54, %v554_v45  ;;  %v570_v62 = vadd.f32 %v569_v55, %v568_v6  ;;  %v588_v14 = vadd.f32 %v587_v56, %v586_v47  ;;  %v593_v15 = vrot.slane %v592_v57, 1 }
 0x5e8   : > { %v625_v0 = vsub.f32 %v562_v60, %v621_v8  ;;  %v638_v1 = vsub.f32 %v576_v29, %v634_v11  ;;  %v606_v16 = vadd.f32 %v605_v30, %v604_v46  ;;  %v845_v18 = vstv %s1427_s24 }
 0x5e9   : > { %v624_v13 = vsub.f32 %v556_v61, %v617_v7  ;;  %v637_v58 = vsub.f32 %v570_v62, %v630_v10  ;;  %v612_v8 = vadd.f32 %v611_v63, %v610_v43  ;;  %v511_v11 = vrot.slane %v1391_v25, 4 }
 0x5ea   : > { %v642_v33 = vrot.slane %v638_v1, 7  ;;  %v594_v7 = vadd.f32 %v593_v15, %v592_v57  ;;  %v767_v17 = vmul.f32 %v1139_v53, %v588_v14  ;;  %1146 = vrcp.f32 %v845_v18 }
 0x5eb   : > { %v641_v12 = vrot.slane %v637_v58, 7  ;;  %v771_v3 = vmul.f32 %v1137_v49, %v606_v16  ;;  %v772_v10 = vmul.f32 %v1137_v49, %v612_v8  ;;  %v805_v20 = vmul.f32 %v1141_v59, %v588_v14 }
 0x5ec   : > { %v647_v4 = vsel %vm1519_vm1, %v625_v0, %v642_v33  ;;  %v768_v32 = vmul.f32 %v1139_v53, %v594_v7  ;;  %1148 = vrcp.f32 %v767_v17  ;;  %v512_v21 = vadd.f32 %v511_v11, %v1391_v25 }
 0x5ed   : > { %v646_v5 = vsel %vm1519_vm1, %v624_v13, %v641_v12  ;;  %v650_v19 = vsel %vm1518_vm2, %v647_v4, %v594_v7  ;;  %v806_v24 = vmul.f32 %v1141_v59, %v594_v7  ;;  %v507_v27 = vrot.slane %v1396_v36, 2 }
 0x5ee   : > { %v649_v9 = vsel %vm1518_vm2, %v646_v5, %v588_v14  ;;  %v653_v48 = vsel %vm651_vm3, %v650_v19, %v612_v8  ;;  %1150 = vrcp.f32 %v768_v32  ;;  %v513_v31 = vrot.slane %v512_v21, 2 }
 0x5ef   : > { %v652_v22 = vsel %vm651_vm3, %v649_v9, %v606_v16  ;;  %1152 = vrcp.f32 %v771_v3  ;;  %v809_v34 = vmul.f32 %v1143_v26, %v606_v16  ;;  %v810_v37 = vmul.f32 %v1143_v26, %v612_v8 }
 0x5f0   : > { %v656_v23 = vcombine.low %v652_v22, %v653_v48  ;;  %1154 = vrcp.f32 %v772_v10  ;;  %v508_v38 = vadd.f32 %v507_v27, %v1396_v36  ;;  %v514_v25 = vadd.f32 %v513_v31, %v512_v21 }
 0x5f1   : > { %1156 = vrcp.f32 %v805_v20  ;;  %vm773_vm6 = vcmp.lt.f32.partialorder %v767_v17, 4.0  ;;  %vm774_vm8 = vcmp.lt.f32.partialorder %v768_v32, 4.0  ;;  %vm783_vm13 = vcmp.lt.f32.partialorder %v771_v3, 4.0  ;;  %v913_v32 = vld [vmem:[%s305_s7] sm:$0x3] }
 0x5f2   : > { %658 = vst [vmem:[%s296_s27] sm:$0xff] %v656_v23  ;;  %1158 = vrcp.f32 %v806_v24  ;;  %v509_v42 = vrot.slane %v508_v38, 1  ;;  %v515_v44 = vrot.slane %v514_v25, 1  ;;  %vm784_vm15 = vcmp.lt.f32.partialorder %v772_v10, 4.0 }
 0x5f3   : > { %v1145_v28 = vpop.eup %1144  ;;  %1160 = vrcp.f32 %v809_v34  ;;  %v1523_v53 = vmov 0  ;;  %v1525_v54 = vmov 0 }
 0x5f4   : > { %v1458_v39 = vmul.f32 %v1145_v28, %v588_v14  ;;  %v1460_v40 = vmul.f32 %v1145_v28, %v594_v7  ;;  %1162 = vrcp.f32 %v810_v37  ;;  %v510_v49 = vadd.f32 %v509_v42, %v508_v38 }
 0x5f5   : > { %v516_v51 = vadd.f32 %v515_v44, %v514_v25 }
 0x5f6   : > { %1164 = vrcp.f32 %v1458_v39  ;;  %vm1520_vm3 = vcmp.gt.f32.partialorder %v510_v49, 0.0 }
 0x5f7   : > { %v1147_v41 = vpop.eup %1146  ;;  %1166 = vrcp.f32 %v1460_v40 }
 0x5f8   : > { %v1464_v6 = vmul.f32 %v1147_v41, %v606_v16  ;;  %v848_v46 = vmul.f32 %v1147_v41, %v612_v8  ;;  %v1207_v16 = vmov 1966171168  }
 0x5f9   : > { %v1149_v43 = vpop.eup %1148  ;;  %v893_v18 = vunpack.c.l.s4 %v1207_v16 }
 0x5fa   : > { %vm779_vm7 = vcmp.lt.f32.partialorder %v1149_v43, 4.0  ;;  %1168 = vrcp.f32 %v1464_v6 }
 0x5fb   : > { %v1151_v45 = vpop.eup %1150  ;;  %vm781_vm12 = vmand %vm773_vm6, %vm779_vm7  ;;  %1170 = vrcp.f32 %v848_v46  ;;  %vm1521_vm6 = vcmp.gt.f32.partialorder %v516_v51, 0.0  ;;  %v894_v5 = vunpack.c.0.s8 %v893_v18 }
 0x5fc   : > { %v1153_v36 = vpop.eup %1152  ;;  %vm780_vm9 = vcmp.lt.f32.partialorder %v1151_v45, 4.0  ;;  %vm785_vm5 = vmand %vm781_vm12, %vm783_vm13  ;;  %vm811_vm12 = vcmp.lt.f32.partialorder %v805_v20, 4.0  ;;  %vm812_vm13 = vcmp.lt.f32.partialorder %v806_v24, 4.0 }
 0x5fd   : > { %v1155_v47 = vpop.eup %1154  ;;  %vm782_vm14 = vmand %vm774_vm8, %vm780_vm9  ;;  %vm791_vm11 = vcmp.lt.f32.partialorder %v1153_v36, 4.0  ;;  %v897_v9 = vsub.s32 %v894_v5, %v1267_v2 }
 0x5fe   : > { %v1157_v50 = vpop.eup %1156  ;;  %vm786_vm4 = vmand %vm782_vm14, %vm784_vm15  ;;  %vm792_vm10 = vcmp.lt.f32.partialorder %v1155_v47, 4.0  ;;  %vm821_vm15 = vcmp.lt.f32.partialorder %v809_v34, 4.0 }
 0x5ff   : > { %v1159_v52 = vpop.eup %1158  ;;  %vm793_vm0 = vmand %vm785_vm5, %vm791_vm11  ;;  %vm817_vm1 = vcmp.lt.f32.partialorder %v1157_v50, 4.0  ;;  %vm822_vm11 = vcmp.lt.f32.partialorder %v810_v37, 4.0 }
 0x600   : > { %vm794_vm2 = vmand %vm786_vm4, %vm792_vm10  ;;  %vm818_vm8 = vcmp.lt.f32.partialorder %v1159_v52, 4.0  ;;  %v1161_v55 = vpop.eup %1160 }
 0x601   : > { %vm1468_vm7 = vmand %vm1520_vm3, %vm793_vm0  ;;  %v1163_v56 = vpop.eup %1162  ;;  %vm829_vm10 = vcmp.lt.f32.partialorder %v1161_v55, 4.0 }
 0x602   : > { %v1524_v53 = vsel %vm1468_vm7, 4294967295, %v1523_v53  ;;  %vm1473_vm9 = vmand %vm1521_vm6, %vm794_vm2  ;;  %vm830_vm3 = vcmp.lt.f32.partialorder %v1163_v56, 4.0 }
 0x603   : > { %v1526_v54 = vsel %vm1473_vm9, 4294967295, %v1525_v54  ;;  %vm819_vm14 = vmand %vm811_vm12, %vm817_vm1  ;;  %v1165_v57 = vpop.eup %1164  ;;  %vm1527_vm2 = vnez %v1524_v53  ;;  %vm1529_vm12 = vcmp.gt.f32.partialorder %v510_v49, 0.0 }
 0x604   : > { %vm820_vm5 = vmand %vm812_vm13, %vm818_vm8  ;;  %v1167_v59 = vpop.eup %1166  ;;  %v1081_v60 = vsel %vm1527_vm2, 1.0, %v1205_v35  ;;  %vm855_vm9 = vcmp.lt.f32.partialorder %v1165_v57, 4.0  ;;  %vm1528_vm1 = vnez %v1526_v54  ;;  %vm860_vm2 = vcmp.lt.f32.partialorder %v848_v46, 4.0 }
 0x605   : > { %vm823_vm4 = vmand %vm819_vm14, %vm821_vm15  ;;  %v1082_v29 = vsel %vm1528_vm1, 1.0, %v1205_v35  ;;  %vm856_vm13 = vcmp.lt.f32.partialorder %v1167_v59, 4.0  ;;  %vm1530_vm14 = vcmp.gt.f32.partialorder %v516_v51, 0.0 }
 0x606   : > { %vm824_vm0 = vmand %vm820_vm5, %vm822_vm11  ;;  %vm849_vm5 = vcmp.lt.f32.partialorder %v1458_v39, 4.0  ;;  %vm850_vm11 = vcmp.lt.f32.partialorder %v1460_v40, 4.0 }
 0x607   : > { %vm831_vm7 = vmand %vm823_vm4, %vm829_vm10  ;;  %v1169_v61 = vpop.eup %1168  ;;  %vm1531_vm4 = vcmask 1040384   ;;  %vm859_vm10 = vcmp.lt.f32.partialorder %v1464_v6, 4.0 }
 0x608   : > { %vm832_vm6 = vmand %vm824_vm0, %vm830_vm3  ;;  %v1171_v0 = vpop.eup %1170  ;;  %vm867_vm1 = vcmp.lt.f32.partialorder %v1169_v61, 4.0 }
 0x609   : > { %vm833_vm8 = vmand %vm1529_vm12, %vm831_vm7 }
 0x60a   : > { %vm834_vm15 = vmand %vm1530_vm14, %vm832_vm6  ;;  %v1085_v30 = vsel %vm833_vm8, 1.0, %v1205_v35  ;;  %vm868_vm8 = vcmp.lt.f32.partialorder %v1171_v0, 4.0 }
 0x60b   : > { %v1086_v62 = vsel %vm834_vm15, 1.0, %v1205_v35  ;;  %vm857_vm3 = vmand %vm849_vm5, %vm855_vm9  ;;  %v877_v63 = vsel %vm1531_vm4, %v1081_v60, %v1085_v30  ;;  %vm1533_vm5 = vcmp.gt.f32.partialorder %v510_v49, 0.0 }
 0x60c   : > { %vm858_vm0 = vmand %vm850_vm11, %vm856_vm13  ;;  %vm1535_vm13 = vcmask 1041408  }
 0x60d   : > { %vm1532_vm7 = vmmov %vm1531_vm4  ;;  %vm1534_vm4 = vcmp.gt.f32.partialorder %v516_v51, 0.0 }
 0x60e   : > { %v878_v1 = vsel %vm1532_vm7, %v1082_v29, %v1086_v62  ;;  %vm861_vm6 = vmand %vm857_vm3, %vm859_vm10  ;;  %vm907_vm3 = vsmask.f32 512  ;;  %vm909_vm10 = vcmask 1041409  }
 0x60f   : > { %vm862_vm12 = vmand %vm858_vm0, %vm860_vm2  ;;  %vm910_vm0 = vsmask.f32 1536  ;;  %vm1537_vm2 = vcmask 1040384  }
 0x610   : > { %vm869_vm14 = vmand %vm861_vm6, %vm867_vm1 }
 0x611   : > { %vm870_vm15 = vmand %vm862_vm12, %vm868_vm8 }
 0x612   : > { %vm871_vm9 = vmand %vm1533_vm5, %vm869_vm14 }
 0x613   : > { %vm872_vm11 = vmand %vm1534_vm4, %vm870_vm15  ;;  %v1089_v13 = vsel %vm871_vm9, 1.0, %v1205_v35 }
 0x614   : > { %v1090_v58 = vsel %vm872_vm11, 1.0, %v1205_v35  ;;  %v879_v14 = vsel %vm1535_vm13, %v877_v63, %v1089_v13  ;;  %vm1536_vm7 = vmmov %vm1535_vm13 }
 0x615   : > { %v880_v15 = vsel %vm1536_vm7, %v878_v1, %v1090_v58  ;;  %v881_v33 = vmax.f32 %v879_v14, -128.0  ;;  %vm908_vm6 = vmand %vm1537_vm2, %vm907_vm3 }
 0x616   : > { %v882_v8 = vmax.f32 %v880_v15, -128.0  ;;  %vm911_vm1 = vmand %vm909_vm10, %vm910_vm0 }
 0x617   : > { %v883_v12 = vmin.f32 %v881_v33, 127.0  ;;  %vm912_vm12 = vmor %vm911_vm1, %vm908_vm6 }
 0x618   : > { %v884_v4 = vmin.f32 %v882_v8, 127.0 }
 0x619   : > { %v1099_v11 = vtrunc.f32 %v883_v12 }
 0x61a   : > { %v1101_v7 = vtrunc.f32 %v884_v4 }
 0x61b   : > { %v1100_v17 = vcvt.f32.s32 %v1099_v11 }
 0x61c   : > { %v1102_v3 = vcvt.f32.s32 %v1101_v7 }
 0x61d   : > { %v887_v35 = vpack.c.b16 %v1100_v17, %v1100_v17 }
 0x61e   : > { %v889_v10 = vpack.c.b16 %v1102_v3, %v1102_v3 }
 0x620   : > { %v1091_v19 = vpack.c.b8 %v889_v10, %v887_v35 }
 0x622   : > { %v898_v22 = vrot.slane %v1091_v19, %v897_v9 }
 0x624   : > { %v905_v48 = vrot.slane %v898_v22, %v897_v9 }
 0x626   : > { %v914_v20 = vsel %vm912_vm12, %v905_v48, %v913_v32 }
 0x627   : > { %915 = vst [vmem:[%s305_s7] sm:$0x3] %v914_v20 }
 0x69b   : > { %v744_v2 = vpop.f32.mrf.mxu1 }
 0x69c   : > { %757 = vst [vmem:[%s301_s11 + $0x10] sm:$0xff] %v744_v2  ;;  %v738_v21 = vpop.f32.mrf.mxu0 }
 0x69d   : > { %755 = vst [vmem:[%s301_s11] sm:$0xff] %v738_v21  ;;  %v746_v23 = vpop.f32.mrf.mxu1 }
 0x69e   : > { %758 = vst [vmem:[%s301_s11 + $0x18] sm:$0xff] %v746_v23  ;;  %v740_v24 = vpop.f32.mrf.mxu0 }
 0x69f   : > { %756 = vst [vmem:[%s301_s11 + $0x8] sm:$0xff] %v740_v24  ;;  %v750_v26 = vpop.f32.mrf.mxu1 }
 0x6a0   : > { %759 = vst [vmem:[%s301_s11 + $0x20] sm:$0xf] %v750_v26 }
 0x6a1   : > { %v752_v27 = vpop.f32.mrf.mxu1 }
 0x6a2   : > { %760 = vst [vmem:[%s301_s11 + $0x28] sm:$0xf] %v752_v27 }
 0x6a3 PF: > { %s18_s21 = sadd.s32 1, %s1197_s21  }
 0x6a4   : > { %p15_p1 = scmp.ge.s32.totalorder %s18_s21, 4  }
 0x6a6   :  { %17 = sbr.rel (!%p15_p1) target bundleno = 1 (0x1), region = 99 }
 0x6ab   :  { %967 = vsyncpa [#allocation3], 1 }
 0x6ac   :  { %969 = vsyncpa [#allocation3 + $0x1], 1 }

</bundles_post_ra>
